<compile_context>
chip_gen: v6e
topology: v6e:2x2x1
jax: 0.10.0
libtpu: 0.0.40
codegen_flags: <defaults>
</compile_context>

<pallas_src>
import functools

import jax
import jax.numpy as jnp
from jax.experimental import pallas as pl
from jax.experimental.pallas import tpu as pltpu

LANES = 128            # vreg lane width
SUBLANES = 8           # f32 sublane packing (accumulator / output block rows)
MAX_TILE_ROWS = 8192   # 8192 x 128 x f32 = 4 MiB per input tile
NUM_SPLITS = 2         # leading "parallel" grid axis -> 2 TensorCores on v7x


def _round_up(v, m):
    return ((v + m - 1) // m) * m


def _mse_partial_kernel(x_ref, t_ref, o_ref, *, rows, tile_rows,
                        steps_per_split, masked):
    """Accumulates per-(sublane, lane) partial sums of (x - t)^2 into o_ref.

    o_ref is an (8, 128) f32 block resident in VMEM across the inner
    ("arbitrary") grid axis; one such block per split (outer "parallel" axis).
    """
    c = pl.program_id(0)      # split (TensorCore on v7x)
    i = pl.program_id(1)      # step within the split

    @pl.when(i == 0)
    def _init():
        o_ref[...] = jnp.zeros_like(o_ref)

    # sub -> square -> (mask) -> sublane-group add: pure VPU work per vreg.
    # No cross-lane/XLU work in the hot loop; the final reduce is done in the
    # wrapper on the tiny partials array.
    d = x_ref[...].astype(jnp.float32) - t_ref[...].astype(jnp.float32)
    sq = d * d
    if masked:
        # Nominal (unclamped) global row offset of this step.  Rows at or
        # past `rows` are either DMA padding of a ragged last block or a
        # duplicated read through the clamped index_map; both are zeroed.
        start = (c * steps_per_split + i) * tile_rows
        row_ids = jax.lax.broadcasted_iota(jnp.int32, (tile_rows, LANES), 0)
        sq = jnp.where(row_ids < rows - start, sq, 0.0)

    o_ref[...] += jnp.sum(
        sq.reshape(tile_rows // SUBLANES, SUBLANES, LANES), axis=0)


def content_loss_forward(x, target, *, max_tile_rows=MAX_TILE_ROWS):
    """Mirrors ContentLoss.forward: returns (input, mse_loss(input, target))."""
    assert x.shape == target.shape, "input/target shapes must match"
    total = x.size
    if total == 0:
        # F.mse_loss on an empty tensor is NaN; mirror that.
        return x, jnp.full((), jnp.nan, dtype=jnp.float32)

    itemsize_x = jnp.dtype(x.dtype).itemsize
    itemsize_t = jnp.dtype(target.dtype).itemsize
    # Sublane packing of the narrowest operand dtype (8 f32 / 16 bf16 / 32 i8).
    pack = max(SUBLANES, 32 // min(itemsize_x, itemsize_t))

    x_flat = x.reshape(-1)          # bitcast, free
    t_flat = target.reshape(-1)     # bitcast, free

    # Only lane-misaligned totals (total % 128 != 0) or micro-inputs need a
    # real pad (which copies the operands); aligned shapes stay zero-copy.
    padded_total = max(_round_up(total, LANES), pack * LANES)
    if padded_total != total:
        pad = padded_total - total
        x_flat = jnp.pad(x_flat, (0, pad))
        t_flat = jnp.pad(t_flat, (0, pad))
    rows = padded_total // LANES
    x2 = x_flat.reshape(rows, LANES)    # bitcast, free
    t2 = t_flat.reshape(rows, LANES)

    max_tile_rows = max(pack, (max_tile_rows // pack) * pack)
    tile_rows = min(max_tile_rows, (rows // pack) * pack)
    total_steps = pl.cdiv(rows, tile_rows)
    steps_per_split = pl.cdiv(total_steps, NUM_SPLITS)

    # Masking is compiled in only when some step would see rows beyond `rows`
    # (ragged last tile, or one split having fewer real steps than the other).
    masked = (total_steps * tile_rows != rows
              or NUM_SPLITS * steps_per_split != total_steps)

    if masked:
        def in_index(c, i):
            # Clamp so the DMA never starts past the array; the kernel masks
            # by the *nominal* row offset, so duplicated reads contribute 0.
            return (jnp.minimum(c * steps_per_split + i, total_steps - 1), 0)
    else:
        def in_index(c, i):
            return (c * steps_per_split + i, 0)

    kernel = functools.partial(
        _mse_partial_kernel, rows=rows, tile_rows=tile_rows,
        steps_per_split=steps_per_split, masked=masked)

    # Pipelined footprint: 2 inputs x 2 buffers x tile (<= 16 MiB at the
    # 8192-row f32 maximum) + small headroom -- inside v7x's 32 MiB scoped /
    # 64 MiB physical VMEM and every other generation's budget.
    tile_bytes = tile_rows * LANES * (itemsize_x + itemsize_t)
    vmem_limit = max(16 << 20, 2 * tile_bytes + (2 << 20))

    partials = pl.pallas_call(
        kernel,
        out_shape=jax.ShapeDtypeStruct((NUM_SPLITS * SUBLANES, LANES),
                                       jnp.float32),
        grid_spec=pltpu.PrefetchScalarGridSpec(
            num_scalar_prefetch=0,
            grid=(NUM_SPLITS, steps_per_split),
            in_specs=[
                pl.BlockSpec((tile_rows, LANES), in_index),
                pl.BlockSpec((tile_rows, LANES), in_index),
            ],
            out_specs=pl.BlockSpec((SUBLANES, LANES), lambda c, i: (c, 0)),
        ),
        compiler_params=pltpu.CompilerParams(
            dimension_semantics=("parallel", "arbitrary"),
            vmem_limit_bytes=int(vmem_limit)),
    )(x2, t2)

    # Final cross-lane/sublane reduce over the tiny (2*8, 128) partials array
    # and normalization by the TRUE element count (zero padding contributes 0
    # to the sum, so this is exact).
    loss = jnp.sum(partials) / jnp.float32(total)

    # Identity pass-through (what ContentLoss.forward returns); `loss` is the
    # value the PyTorch module stashes on self.loss.
    return x, loss


if __name__ == "__main__":
    key = jax.random.PRNGKey(0)
    ks = jax.random.split(key, 8)

    # 1) NCHW feature map, lane-aligned (zero-copy path): batch=2, ch=4, 16x16.
    x = jax.random.normal(ks[0], (2, 4, 16, 16), dtype=jnp.float32)
    target = jax.random.normal(ks[1], (2, 4, 16, 16), dtype=jnp.float32)
    out, loss = content_loss_forward(x, target)
    jax.block_until_ready(loss)
    ref = jnp.mean((x - target) ** 2)
    assert jnp.allclose(loss, ref, rtol=1e-5, atol=1e-6), (loss, ref)
    assert jnp.array_equal(out, x)

    # 2) Lane-misaligned shape: exercises the (rare) pad fallback.
    x2 = jax.random.normal(ks[2], (2, 3, 13, 13), dtype=jnp.float32)
    t2 = jax.random.normal(ks[3], (2, 3, 13, 13), dtype=jnp.float32)
    out2, loss2 = content_loss_forward(x2, t2)
    jax.block_until_ready(loss2)
    ref2 = jnp.mean((x2 - t2) ** 2)
    assert jnp.allclose(loss2, ref2, rtol=1e-5, atol=1e-6), (loss2, ref2)
    assert jnp.array_equal(out2, x2)

    # 3) Lane-aligned but row-ragged w.r.t. the tile: exercises in-kernel
    #    masking of the padded last block (zero-copy, no jnp.pad).
    x3 = jax.random.normal(ks[4], (2, 4, 18, 16), dtype=jnp.float32)
    t3 = jax.random.normal(ks[5], (2, 4, 18, 16), dtype=jnp.float32)
    out3, loss3 = content_loss_forward(x3, t3)
    jax.block_until_ready(loss3)
    ref3 = jnp.mean((x3 - t3) ** 2)
    assert jnp.allclose(loss3, ref3, rtol=1e-5, atol=1e-6), (loss3, ref3)
    assert jnp.array_equal(out3, x3)

    # 4) Fully aligned multi-step case (small max_tile_rows to keep shapes
    #    small): exercises the unmasked lean path and the 2-way split with
    #    multiple accumulation steps per split.
    x4 = jax.random.normal(ks[6], (2, 64, 32, 32), dtype=jnp.float32)
    t4 = jax.random.normal(ks[7], (2, 64, 32, 32), dtype=jnp.float32)
    out4, loss4 = content_loss_forward(x4, t4, max_tile_rows=256)
    jax.block_until_ready(loss4)
    ref4 = jnp.mean((x4 - t4) ** 2)
    assert jnp.allclose(loss4, ref4, rtol=1e-4, atol=1e-6), (loss4, ref4)
    assert jnp.array_equal(out4, x4)

    print("KERNEL_OK")
</pallas_src>

<mosaic_0001>
module attributes {stable_mosaic.version = 11 : i64} {
  func.func @_mse_partial_kernel(%arg0: i32, %arg1: i32, %arg2: memref<16x128xf32, #tpu.memory_space<vmem>>, %arg3: memref<16x128xf32, #tpu.memory_space<vmem>>, %arg4: memref<8x128xf32, #tpu.memory_space<vmem>>) attributes {dimension_semantics = [#tpu.dimension_semantics<parallel>, #tpu.dimension_semantics<arbitrary>], iteration_bounds = array<i64: 2, 1>, scalar_prefetch = 0 : i64, scratch_operands = 0 : i64, tpu.core_type = #tpu.core_type<tc>, window_params = [{transform_indices = @transform_0, window_bounds = array<i64: 16, 128>}, {transform_indices = @transform_1, window_bounds = array<i64: 16, 128>}, {transform_indices = @transform_2, window_bounds = array<i64: 8, 128>}]} {
    %c0_i32 = arith.constant 0 : i32
    %0 = arith.cmpi eq, %arg1, %c0_i32 : i32
    %1 = arith.extui %0 : i1 to i32
    %c0_i32_0 = arith.constant 0 : i32
    %2 = arith.cmpi ne, %1, %c0_i32_0 : i32
    scf.if %2 {
      %cst_10 = arith.constant 0.000000e+00 : f32
      %21 = vector.broadcast %cst_10 : f32 to vector<8x128xf32>
      %c0_11 = arith.constant 0 : index
      %c0_12 = arith.constant 0 : index
      %22 = vector.load %arg4[%c0_11, %c0_12] : memref<8x128xf32, #tpu.memory_space<vmem>>, vector<8x128xf32>
      tpu.vector_store %arg4[%c0_11, %c0_12], %21 {strides = array<i32>} : memref<8x128xf32, #tpu.memory_space<vmem>>, vector<8x128xf32>,
    } else {
    }
    %c0 = arith.constant 0 : index
    %c0_1 = arith.constant 0 : index
    %3 = vector.load %arg2[%c0, %c0_1] : memref<16x128xf32, #tpu.memory_space<vmem>>, vector<16x128xf32>
    %c0_2 = arith.constant 0 : index
    %c0_3 = arith.constant 0 : index
    %4 = vector.load %arg3[%c0_2, %c0_3] : memref<16x128xf32, #tpu.memory_space<vmem>>, vector<16x128xf32>
    %5 = arith.subf %3, %4 : vector<16x128xf32>
    %6 = arith.mulf %5, %5 : vector<16x128xf32>
    %c1_i32 = arith.constant 1 : i32
    %7 = arith.muli %arg0, %c1_i32 : i32
    %8 = arith.addi %7, %arg1 : i32
    %c16_i32 = arith.constant 16 : i32
    %9 = arith.muli %8, %c16_i32 : i32
    %10 = tpu.iota {dimensions = array<i32: 0>} : vector<16x128xi32>
    %c16_i32_4 = arith.constant 16 : i32
    %11 = arith.subi %c16_i32_4, %9 : i32
    %12 = vector.broadcast %11 : i32 to vector<16x128xi32>
    %13 = arith.cmpi slt, %10, %12 : vector<16x128xi32>
    %cst = arith.constant 0.000000e+00 : f32
    %14 = vector.broadcast %cst : f32 to vector<16x128xf32>
    %15 = arith.select %13, %6, %14 : vector<16x128xi1>, vector<16x128xf32>
    %c0_5 = arith.constant 0 : index
    %c0_6 = arith.constant 0 : index
    %16 = vector.load %arg4[%c0_5, %c0_6] : memref<8x128xf32, #tpu.memory_space<vmem>>, vector<8x128xf32>
    %17 = vector.shape_cast %15 : vector<16x128xf32> to vector<2x8x128xf32>
    %cst_7 = arith.constant dense<0.000000e+00> : vector<8x128xf32>
    %18 = vector.multi_reduction <add>, %17, %cst_7 [0] : vector<2x8x128xf32> to vector<8x128xf32>
    %19 = arith.addf %16, %18 : vector<8x128xf32>
    %c0_8 = arith.constant 0 : index
    %c0_9 = arith.constant 0 : index
    %20 = vector.load %arg4[%c0_8, %c0_9] : memref<8x128xf32, #tpu.memory_space<vmem>>, vector<8x128xf32>
    tpu.vector_store %arg4[%c0_8, %c0_9], %19 {strides = array<i32>} : memref<8x128xf32, #tpu.memory_space<vmem>>, vector<8x128xf32>,
    return
  }
  func.func @transform_0(%arg0: i32, %arg1: i32) -> (i32, i32) {
    %c1_i32 = arith.constant 1 : i32
    %0 = arith.muli %arg0, %c1_i32 : i32
    %1 = arith.addi %0, %arg1 : i32
    %c0_i32 = arith.constant 0 : i32
    %2 = arith.minsi %1, %c0_i32 : i32
    %c0_i32_0 = arith.constant 0 : i32
    %c0_i32_1 = arith.constant 0 : i32
    return %2, %c0_i32_0 : i32, i32
  }
  func.func @transform_1(%arg0: i32, %arg1: i32) -> (i32, i32) {
    %c1_i32 = arith.constant 1 : i32
    %0 = arith.muli %arg0, %c1_i32 : i32
    %1 = arith.addi %0, %arg1 : i32
    %c0_i32 = arith.constant 0 : i32
    %2 = arith.minsi %1, %c0_i32 : i32
    %c0_i32_0 = arith.constant 0 : i32
    %c0_i32_1 = arith.constant 0 : i32
    return %2, %c0_i32_0 : i32, i32
  }
  func.func @transform_2(%arg0: i32, %arg1: i32) -> (i32, i32) {
    %c0_i32 = arith.constant 0 : i32
    %c0_i32_0 = arith.constant 0 : i32
    return %arg0, %c0_i32 : i32, i32
  }
}

</mosaic_0001>

<bundles_post_ra>
// kernel: tpu_custom_call.1
= control target key start
LH: loop header
LB: loop body
LE: loop exit
PB: predicated region body
PF: predicated region fallthrough
CT: control target
= control target key end

     0   :  { %7 = vsyncpa [#allocation3], 0  ;;  %s860_s0 = inlined_call_operand.hbm [shape: f32[16,128], index: 0, kind: input, shape index: {}]   ;;  %s861_s1 = inlined_call_operand.hbm [shape: f32[16,128], index: 1, kind: input, shape index: {}]   ;;  %s862_s2 = inlined_call_operand.hbm [shape: f32[16,128], index: 2, kind: output, shape index: {}]  }
   0x1   :  { %9 = vsyncpa [#allocation3 + $0x1], 0 }
   0x2   :  { %10 = vsyncpa [#allocation6], 0 }
   0x3   :  { %12 = vsyncpa [#allocation6 + $0x1], 0 }
   0x4   :  { %13 = vsyncpa [#allocation4], 0 }
   0x5   :  { %15 = vsyncpa [#allocation4 + $0x1], 0  ;;  %s681_s9 = smov 0   ;;  %s683_s10 = smov 0  }
   0x6   :  { %s685_s11 = smov 0   ;;  %s687_s12 = smov 0  }
   0x7   :  { %s689_s13 = smov 0   ;;  %s691_s14 = smov 0  }
   0x8   :  { %s693_s15 = smov 0   ;;  %s695_s16 = smov 0  }
   0x9 LB: > { %s383_s17 = sadd.s32 4294967295, %s659_s16   ;;  %s384_s18 = sadd.s32 4294967294, %s659_s16   ;;  %s659_s16 = sphi %s695_s16, %s21_s16   ;;  %s655_s15 = sphi %s693_s15, %s881_s15   ;;  %s651_s14 = sphi %s691_s14, %s880_s14   ;;  %s647_s13 = sphi %s689_s13, %s850_s13   ;;  %s643_s12 = sphi %s687_s12, %s879_s12   ;;  %s639_s11 = sphi %s685_s11, %s878_s11   ;;  %s635_s10 = sphi %s683_s10, %s877_s10   ;;  %s631_s9 = sphi %s681_s9, %s876_s9  }
   0xa   : > { %s33_s19 = sadd.s32 1, %s655_s15  ;;  %p628_p1 = scmp.ne.s32.totalorder %s647_s13, 0 }
   0xb   : > { %p35_p0 = scmp.ge.s32.totalorder %s33_s19, 2  ;;  %p54_p2 = scmp.eq.s32.totalorder %s659_s16, 0 }
   0xc   : > { %p59_p3 = scmp.ne.s32.totalorder %s647_s13, %s643_s12  ;;  %p60_p5 = scmp.eq.s32.totalorder %s383_s17, 0 }
   0xd   : > { %s883_s19 = smov (%p35_p0, %s33_s19), 0  ;;  %p727_p4 = por %p628_p1, %p54_p2 }
   0xe   : > { %p731_p6 = por %p60_p5, %p59_p3  ;;  %s101_s22 = ssub.s32 %s655_s15, %s883_s19 }
   0xf   : > { %p102_p7 = scmp.eq.s32.totalorder %s101_s22, 0  ;;  %s104_s23 = sadd.s32 1, %s639_s11 }
  0x10   : > { %s866_s21 = scalar_select %p731_p6, 1, 0 }
  0x11   : > { %s739_s24 = scalar_select %p102_p7, %s639_s11, %s104_s23  }
  0x12   : > { %p114_p8 = scmp.ne.s32.totalorder %s639_s11, %s635_s10  ;;  %p115_p9 = scmp.eq.s32.totalorder %s383_s17, 1 }
  0x13   : > { %p120_p10 = scmp.ne.s32.totalorder %s635_s10, %s631_s9  ;;  %p121_p11 = scmp.eq.s32.totalorder %s384_s18, 1 }
  0x14   : > { %p745_p12 = por %p115_p9, %p114_p8  ;;  %p421_p1 = scmp.lt.s32.totalorder %s659_s16, 2 }
  0x15   : > { %p750_p0 = por %p121_p11, %p120_p10  ;;  %s661_s27 = smov [#allocation2]  }
  0x16   : > { %s867_s25 = scalar_select %p745_p12, 1, 0 }
  0x17   : > { %s868_s26 = scalar_select %p750_p0, 1, 0 }
  0x18   : > { %s155_s28 = sshll.u32 %s661_s27, 4  ;;  %p757_p2 = pnand %p421_p1, %p727_p4  ;;  %s156_s28 = int_to_ptr.vmem [resolvable:$true] %s155_s28 }
  0x19   : > { %s498_s4 = scalar_lea.hbm %s860_s0, 256 }
  0x1a   : > { %p499_p3 = scmp.ne.s32.totalorder %s860_s0, %s498_s4  ;;  %p500_p5 = pneg %p757_p2 }
  0x1b   : > { %p505_p8 = scmp.lt.s32.totalorder %s498_s4, %s498_s4 }
  0x1c   : > { %p501_p7 = pnand %p500_p5, %p499_p3 }
  0x1e   : > { %p502_p4 = pneg %p501_p7 }
  0x20   : > { %p507_p9 = pnand %p505_p8, %p502_p4 }
  0x22   : > { %510 = shalt.err (!%p507_p9)
}
  0x23   : > { %s511_s7 = scalar_lea.vmem %s156_s28, 256  ;;  %s518_s8 = scalar_lea.vmem %s156_s28, 512 }
  0x24   : > { %p512_p10 = scmp.ne.s32.totalorder %s156_s28, %s511_s7  ;;  %p519_p13 = scmp.lt.s32.totalorder %s156_s28, %s156_s28 }
  0x25   : > { %p520_p0 = scmp.lt.s32.totalorder %s518_s8, %s511_s7 }
  0x26   : > { %p514_p11 = pnand %p512_p10, %p500_p5 }
  0x27   : > { %p521_p12 = por %p520_p0, %p519_p13 }
  0x28   : > { %p515_p1 = pneg %p514_p11 }
  0x2a   : > { %p522_p6 = pnand %p521_p12, %p515_p1 }
  0x2c   : > { %525 = shalt.err (!%p522_p6)
}
  0x2d   : > { %s662_s12 = smov 128   ;;  %s663_s17 = smov 8  }
  0x2e   : > { %413 = dma.hbm_to_vmem [thread:$0]  (!%p757_p2), %s860_s0, 256, %s156_s28, [#allocation3], %s662_s12, %s662_s12, %s663_s17  }
  0x2f   : > { %p393_p3 = scmp.ge.s32.totalorder %s659_s16, 1  ;;  %p187_p7 = scmp.lt.s32.totalorder %s659_s16, 3 }
  0x30   : > { %s664_s23 = smov [#allocation5]   ;;  %s526_s4 = scalar_lea.hbm %s861_s1, 256 }
  0x31   : > { %p782_p4 = pnand %p393_p3, %p187_p7  ;;  %s179_s27 = sshll.u32 %s664_s23, 4  ;;  %s180_s27 = int_to_ptr.vmem [resolvable:$true] %s179_s27 }
  0x32   : > { %p527_p6 = scmp.ne.s32.totalorder %s861_s1, %s526_s4  ;;  %p533_p0 = scmp.lt.s32.totalorder %s526_s4, %s526_s4 }
  0x33   : > { %s870_s22 = scalar_select %p782_p4, 1, 0 }
  0x34   : > { %p529_p12 = pnand %p527_p6, %p500_p5 }
  0x36   : > { %p530_p13 = pneg %p529_p12 }
  0x38   : > { %p535_p8 = pnand %p533_p0, %p530_p13 }
  0x3a   : > { %538 = shalt.err (!%p535_p8)
}
  0x3b   : > { %s539_s28 = scalar_lea.vmem %s180_s27, 256  ;;  %s546_s7 = scalar_lea.vmem %s180_s27, 512 }
  0x3c   : > { %p540_p9 = scmp.ne.s32.totalorder %s180_s27, %s539_s28  ;;  %p547_p1 = scmp.lt.s32.totalorder %s180_s27, %s180_s27 }
  0x3d   : > { %p548_p3 = scmp.lt.s32.totalorder %s546_s7, %s539_s28 }
  0x3e   : > { %p542_p10 = pnand %p540_p9, %p500_p5 }
  0x3f   : > { %p549_p7 = por %p548_p3, %p547_p1 }
  0x40   : > { %p543_p11 = pneg %p542_p10 }
  0x42   : > { %p550_p4 = pnand %p549_p7, %p543_p11 }
  0x44   : > { %553 = shalt.err (!%p550_p4)
}
  0x45   : > { %416 = dma.hbm_to_vmem [thread:$0]  (!%p757_p2), %s861_s1, 256, %s180_s27, [#allocation6], %s662_s12, %s662_s12, %s663_s17  }
  0x46   : > { %p871_p6 = scmp.ne.s32.totalorder %s870_s22, 0 }
  0x47   : > { %s193_s20 = sand.u32 (!%p871_p6), 1, %s647_s13   ;;  %p872_p5 = scmp.ne.s32.totalorder (!%p871_p6), %s866_s21, 0 }
  0x48   : > { %191 = sbr.rel (%p871_p6) target bundleno = 107 (0x6b), region = 28  ;;  %s394_s23 = sshll.u32 (!%p871_p6), %s193_s20, 4 }
  0x49   : > { %s194_s30 = scalar_lea.sflag (!%p871_p6), [#allocation3], %s193_s20  ;;  %s197_s3 = scalar_lea.vmem (!%p871_p6), [#allocation2], %s394_s23 }
  0x4d   : > { %617 = dma.done.wait (%p872_p5), %s194_s30, 256  }
  0x4e   : > { %619 = vsyncadd (%p872_p5), %s194_s30, 4294967040  ;;  %s203_s29 = scalar_lea.sflag [#allocation6], %s193_s20  ;;  %s206_s4 = scalar_lea.vmem [#allocation5], %s394_s23 }
  0x4f   : > { %621 = dma.done.wait (%p872_p5), %s203_s29, 256  }
  0x50   : > { %623 = vsyncadd (%p872_p5), %s203_s29, 4294967040  ;;  %s397_s12 = sshll.u32 %s651_s14, 4  ;;  %v255_v0 = vlaneseq  ;;  %s229_s22 = sand.u32 1, %s635_s10   ;;  %v245_v4 = vld [vmem:[%s197_s3] sm:$0xff]  ;;  %v246_v5 = vld [vmem:[%s197_s3 + $0x8] sm:$0xff] }
  0x51   : > { %s258_s17 = ssub.s32 16, %s397_s12  ;;  %s396_s27 = sshll.u32 %s229_s22, 3  ;;  %v247_v6 = vld [vmem:[%s206_s4] sm:$0xff]  ;;  %v248_v7 = vld [vmem:[%s206_s4 + $0x8] sm:$0xff] }
  0x52   : > { %v256_v1 = vshrl.u32 %v255_v0, 7  ;;  %v259_v3 = vstv %s258_s17  ;;  %v249_v8 = vsub.f32 %v245_v4, %v247_v6  ;;  %v250_v9 = vsub.f32 %v246_v5, %v248_v7  ;;  %s399_s21 = sshll.u32 %s651_s14, 7  ;;  %s231_s5 = scalar_lea.vmem [#allocation7], %s396_s27 }
  0x53   : > { %s282_s6 = sshll.u32 %s231_s5, 4  ;;  %s280_s8 = scalar_lea.hbm %s862_s2, %s399_s21  ;;  %s283_s6 = int_to_ptr.vmem [resolvable:$true] %s282_s6 }
  0x54   : > { %v257_v2 = vadd.s32 8, %v256_v1  ;;  %vm260_vm0 = vcmp.lt.s32.totalorder %v256_v1, %v259_v3  ;;  %v251_v10 = vmul.f32 %v249_v8, %v249_v8  ;;  %v252_v11 = vmul.f32 %v250_v9, %v250_v9  ;;  %s269_s18 = scalar_lea.sflag [#allocation4], %s229_s22  ;;  %s554_s20 = scalar_lea.vmem %s283_s6, 128 }
  0x55   : > { %p555_p2 = scmp.ne.s32.totalorder %s283_s6, %s554_s20  ;;  %p873_p4 = scmp.ne.s32.totalorder %s867_s25, 0 }
  0x56   : > { %vm261_vm1 = vcmp.lt.s32.totalorder %v257_v2, %v259_v3  ;;  %v262_v12 = vsel %vm260_vm0, %v251_v10, 0.0  ;;  %s665_s23 = smov [#allocation7]  }
  0x57   : > { %v263_v13 = vsel %vm261_vm1, %v252_v11, 0.0  ;;  %p556_p12 = pnand %p555_p2, %p873_p4  ;;  %s558_s30 = sshll.u32 %s665_s23, 4  ;;  %s559_s30 = int_to_ptr.vmem [resolvable:$false] %s558_s30 }
  0x58   : > { %v265_v14 = vadd.f32 %v263_v13, %v262_v12  ;;  %s560_s3 = scalar_lea.vmem %s559_s30, 256  ;;  %p561_p0 = scmp.lt.s32.totalorder %s283_s6, %s559_s30 }
  0x59   : > { %p557_p13 = pneg %p556_p12  ;;  %p562_p8 = scmp.lt.s32.totalorder %s560_s3, %s554_s20 }
  0x5a   : > { %267 = vst [vmem:[%s231_s5] sm:$0xff] %v265_v14 }
  0x5b   : > { %p563_p9 = por %p562_p8, %p561_p0 }
  0x5d   : > { %p564_p10 = pnand %p563_p9, %p557_p13 }
  0x5f   : > { %567 = shalt.err (!%p564_p10)
}
  0x60   : > { %s568_s14 = scalar_lea.hbm %s280_s8, 128  ;;  %s572_s12 = scalar_lea.hbm %s862_s2, 256 }
  0x61   : > { %p569_p11 = scmp.ne.s32.totalorder %s280_s8, %s568_s14  ;;  %p573_p7 = scmp.lt.s32.totalorder %s280_s8, %s862_s2 }
  0x62   : > { %p574_p6 = scmp.lt.s32.totalorder %s572_s12, %s568_s14 }
  0x63   : > { %p570_p1 = pnand %p569_p11, %p873_p4 }
  0x64   : > { %p575_p5 = por %p574_p6, %p573_p7 }
  0x65   : > { %p571_p3 = pneg %p570_p1 }
  0x67   : > { %p576_p2 = pnand %p575_p5, %p571_p3 }
  0x69   : > { %579 = shalt.err (!%p576_p2)
}
  0x6a   : > { %408 = dma.vmem_to_hbm [thread:$0]  (%p873_p4), %s283_s6, 128, %s280_s8, %s269_s18  }
  0x6b PF: > { %s294_s27 = sand.u32 1, %s631_s9   ;;  %p874_p12 = scmp.ne.s32.totalorder %s868_s26, 0 }
  0x6c   : > { %p875_p13 = scmp.ge.s32.totalorder %s659_s16, 2  ;;  %s295_s21 = scalar_lea.sflag [#allocation4], %s294_s27 }
  0x6e   : > { %p418_p0 = pnand %p875_p13, %p874_p12 }
  0x70   : > { %p419_p8 = pneg %p418_p0 }
  0x72   : > { %625 = dma.done.wait (%p419_p8), %s295_s21, 128  }
  0x73   : > { %627 = vsyncadd (%p419_p8), %s295_s21, 4294967168  ;;  %s21_s16 = sadd.s32 1, %s659_s16   ;;  %s876_s9 = smov %s635_s10 }
  0x74   : > { %p18_p9 = scmp.ge.s32.totalorder %s21_s16, 4   ;;  %s877_s10 = smov %s639_s11 }
  0x75   : > { %s878_s11 = smov %s739_s24  ;;  %s879_s12 = smov %s647_s13 }
  0x76   : > { %s850_s13 = smov 0   ;;  %s880_s14 = smov %s655_s15 }
  0x77   : > { %s881_s15 = smov %s883_s19  ;;  %20 = sbr.rel (!%p18_p9) target bundleno = 9 (0x9), region = 90 }
  0x7c   :  { %300 = vsyncpa [#allocation3], 1 }
  0x7d   :  { %302 = vsyncpa [#allocation3 + $0x1], 1 }
  0x7e   :  { %303 = vsyncpa [#allocation6], 1 }
  0x7f   :  { %305 = vsyncpa [#allocation6 + $0x1], 1 }
  0x80   :  { %306 = vsyncpa [#allocation4], 1 }
  0x81   :  { %308 = vsyncpa [#allocation4 + $0x1], 1 }

</bundles_post_ra>
